<compile_context>
chip_gen: v6e
topology: v6e:2x2x1
jax: 0.10.0
libtpu: 0.0.40
codegen_flags: <defaults>
</compile_context>

<pallas_src>
import math

import jax
import jax.numpy as jnp
from jax.experimental import pallas as pl
from jax.experimental.pallas import tpu as pltpu

EMBED_DIM = 64
HEADS = 4
NEG_BIG = 1e30     # additive mask magnitude (f32, in-kernel); exp underflows to 0


# --------------------------------------------------------------------------
# helpers
# --------------------------------------------------------------------------
def _full_spec(arr):
    zeros = (0,) * arr.ndim
    return pl.BlockSpec(arr.shape, lambda *_: zeros)


def _round_up(a, b):
    return ((a + b - 1) // b) * b


def _vmem_limit_bytes():
    try:
        info = pltpu.get_tpu_info()
        cap = int(getattr(info, "vmem_capacity_bytes", 128 * (1 << 20)))
    except Exception:
        cap = 128 * (1 << 20)
    # leave headroom: ~3/4 of physical (48 MiB on v7x, 96 MiB on v5e/v6e)
    return int(max(32 * (1 << 20), min(cap * 3 // 4, 112 * (1 << 20))))


def _plan_tiles(n, row_tile, col_tile):
    cap = _vmem_limit_bytes()
    default = 512 if cap >= 90 * (1 << 20) else 256     # bigger tiles on v5e/v6e
    rt = default if row_tile is None else row_tile
    ct = default if col_tile is None else col_tile
    n8 = _round_up(n, 8)
    if n8 <= rt:
        rt = n8                            # single row tile
    else:
        rt = max(32, (rt // 32) * 32)      # packed (int8/bf16) sublane alignment
    if n8 <= ct:
        n_pad = _round_up(n8, rt)
        ct = n_pad                         # single column tile
    else:
        ct = max(128, (ct // 128) * 128)   # lane-aligned column blocks
        n_pad = _round_up(n8, math.lcm(rt, ct))
    return rt, ct, n_pad


# --------------------------------------------------------------------------
# Hoisted per-layer projection kernel (row-parallel; runs once per node)
#   x (or emb + relu(fc(pos)))  ->  xw = x @ W  (bf16),  coef = xw @ A^T  [N,2H]
# --------------------------------------------------------------------------
def make_proj_kernel(*, fuse_prep, apply_relu):
    def kernel(*args):
        if fuse_prep:
            emb_ref, pos_ref, fcw_ref, fcb_ref, w_ref, a_ref, xw_ref, coef_ref = args
            proj = jnp.maximum(pos_ref[...] * fcw_ref[...] + fcb_ref[...], 0.0)
            x = emb_ref[...] + proj
        else:
            x_ref, w_ref, a_ref, xw_ref, coef_ref = args
            x = x_ref[...]
            if apply_relu:
                x = jnp.maximum(x, 0.0)
        xw = jnp.dot(x.astype(jnp.bfloat16), w_ref[...],
                     preferred_element_type=jnp.float32)             # [TM, H*Cout]
        xw_bf = xw.astype(jnp.bfloat16)
        coef_ref[...] = jnp.dot(xw_bf, a_ref[...],
                                preferred_element_type=jnp.float32)  # [TM, 2H]
        xw_ref[...] = xw_bf
    return kernel


def run_projection(x_inputs, w_bf, a_t_bf, *, n_pad, tm, heads, hcout,
                   fuse_prep, apply_relu, vmem_limit):
    grid = (n_pad // tm,)
    if fuse_prep:
        emb, pos1, fcw, fcb = x_inputs
        in_specs = [pl.BlockSpec((tm, emb.shape[1]), lambda i: (i, 0)),
                    pl.BlockSpec((tm, 1), lambda i: (i, 0)),
                    _full_spec(fcw), _full_spec(fcb)]
    else:
        (x,) = x_inputs
        in_specs = [pl.BlockSpec((tm, x.shape[1]), lambda i: (i, 0))]
    in_specs += [_full_spec(w_bf), _full_spec(a_t_bf)]
    out_shape = (jax.ShapeDtypeStruct((n_pad, hcout), jnp.bfloat16),
                 jax.ShapeDtypeStruct((n_pad, 2 * heads), jnp.float32))
    out_specs = [pl.BlockSpec((tm, hcout), lambda i: (i, 0)),
                 pl.BlockSpec((tm, 2 * heads), lambda i: (i, 0))]
    return pl.pallas_call(
        make_proj_kernel(fuse_prep=fuse_prep, apply_relu=apply_relu),
        out_shape=out_shape,
        grid_spec=pltpu.PrefetchScalarGridSpec(
            num_scalar_prefetch=0, grid=grid,
            in_specs=in_specs, out_specs=out_specs),
        compiler_params=pltpu.CompilerParams(
            dimension_semantics=("parallel",),
            vmem_limit_bytes=vmem_limit),
    )(*x_inputs, w_bf, a_t_bf)


# --------------------------------------------------------------------------
# GAT attention kernel: (row tiles "parallel") x (source/column tiles
# "arbitrary") with flash-style online softmax per destination row.
# --------------------------------------------------------------------------
def make_attn_kernel(*, heads, c_out, use_eattr):
    def kernel(*args):
        idx = 0
        cdst_ref, csrc_ref, xw_ref, adj_ref = args[idx:idx + 4]
        idx += 4
        if use_eattr:
            eattr_ref = args[idx]
            idx += 1
        k_ref, bias_ref, out_ref, m_sc, l_sc, acc_sc = args[idx:idx + 6]

        j = pl.program_id(1)

        @pl.when(j == 0)
        def _init():
            m_sc[...] = jnp.full_like(m_sc, -NEG_BIG)
            l_sc[...] = jnp.zeros_like(l_sc)
            acc_sc[...] = jnp.zeros_like(acc_sc)

        adj = adj_ref[...].astype(jnp.float32)              # [TM, TN] in {0, 1}
        mneg = (adj - 1.0) * NEG_BIG                        # 0 on edges, -1e30 off
        if use_eattr:
            eattr = eattr_ref[...].astype(jnp.float32)      # [TM, TN]
        cdst = cdst_ref[...]                                # [TM, 2H]  f32
        csrc = csrc_ref[...]                                # [2H, TN]  f32
        xw_col = xw_ref[...]                                # [TN, H*Cout]  bf16

        for h in range(heads):
            lo = h * c_out
            raw = cdst[:, heads + h:heads + h + 1] + csrc[h:h + 1, :]
            if use_eattr:
                raw = raw + eattr * k_ref[h]
            s = jnp.maximum(raw, 0.2 * raw) + mneg          # LeakyReLU(0.2) + mask
            m_old = m_sc[:, h:h + 1]
            m_new = jnp.maximum(m_old, jnp.max(s, axis=-1, keepdims=True))
            scale = jnp.exp(m_old - m_new)
            p = jnp.exp(s - m_new)                          # masked -> exact 0
            l_sc[:, h:h + 1] = (scale * l_sc[:, h:h + 1]
                                + jnp.sum(p, axis=-1, keepdims=True))
            acc_sc[:, lo:lo + c_out] = (
                scale * acc_sc[:, lo:lo + c_out]
                + jnp.dot(p.astype(jnp.bfloat16), xw_col[:, lo:lo + c_out],
                          preferred_element_type=jnp.float32))
            m_sc[:, h:h + 1] = m_new

        @pl.when(j == pl.num_programs(1) - 1)
        def _finalize():
            for h in range(heads):
                lo = h * c_out
                inv = pl.reciprocal(l_sc[:, h:h + 1], approx=True)
                acc_sc[:, lo:lo + c_out] = acc_sc[:, lo:lo + c_out] * inv
            # single lane-dense [TM, H*Cout] store
            out_ref[...] = (acc_sc[...] + bias_ref[...]).astype(out_ref.dtype)
    return kernel


def run_attention(coef, csrc_t, xw_bf, adj, eattr, k_edge, bias2d, *,
                  n_pad, tm, tn, heads, c_out, vmem_limit):
    hcout = heads * c_out
    grid = (n_pad // tm, n_pad // tn)
    operands = [coef, csrc_t, xw_bf, adj]
    in_specs = [
        pl.BlockSpec((tm, 2 * heads), lambda i, j: (i, 0)),   # dst coefficients
        pl.BlockSpec((2 * heads, tn), lambda i, j: (0, j)),   # src coefficients (T)
        pl.BlockSpec((tn, hcout), lambda i, j: (j, 0)),       # source features
        pl.BlockSpec((tm, tn), lambda i, j: (i, j)),          # adjacency (int8)
    ]
    if eattr is not None:
        operands.append(eattr)
        in_specs.append(pl.BlockSpec((tm, tn), lambda i, j: (i, j)))
    operands += [k_edge, bias2d]
    in_specs += [pl.BlockSpec(memory_space=pltpu.MemorySpace.SMEM),
                 _full_spec(bias2d)]
    return pl.pallas_call(
        make_attn_kernel(heads=heads, c_out=c_out, use_eattr=eattr is not None),
        out_shape=jax.ShapeDtypeStruct((n_pad, hcout), jnp.float32),
        grid_spec=pltpu.PrefetchScalarGridSpec(
            num_scalar_prefetch=0, grid=grid,
            in_specs=in_specs,
            out_specs=pl.BlockSpec((tm, hcout), lambda i, j: (i, 0)),
            scratch_shapes=[pltpu.VMEM((tm, heads), jnp.float32),   # running max
                            pltpu.VMEM((tm, heads), jnp.float32),   # running denom
                            pltpu.VMEM((tm, hcout), jnp.float32)]), # accumulator
        compiler_params=pltpu.CompilerParams(
            dimension_semantics=("parallel", "arbitrary"),
            vmem_limit_bytes=vmem_limit),
    )(*operands)


# --------------------------------------------------------------------------
# Parameters and dense graph construction (plain-JAX glue)
# --------------------------------------------------------------------------
def _randn(key, shape, scale=0.1):
    return scale * jax.random.normal(key, shape, jnp.float32)


def init_gat_params(key, c_in, c_out, heads):
    ks = jax.random.split(key, 6)
    return dict(
        w=_randn(ks[0], (c_in, heads * c_out)),
        att_src=_randn(ks[1], (heads, c_out)),
        att_dst=_randn(ks[2], (heads, c_out)),
        w_edge=_randn(ks[3], (heads * c_out,)),
        att_edge=_randn(ks[4], (heads, c_out)),
        bias=_randn(ks[5], (heads * c_out,)),
    )


def init_params(key, num_embeddings, depth):
    ks = jax.random.split(key, 8)
    params = dict(
        embed=_randn(ks[0], (num_embeddings, EMBED_DIM), 1.0),
        fc_w=_randn(ks[1], (1, EMBED_DIM)),
        fc_b=_randn(ks[2], (1, EMBED_DIM)),
    )
    if depth == 1:
        params["gat"] = [init_gat_params(ks[3], 64, 16, HEADS)]
    elif depth == 2:
        params["gat"] = [init_gat_params(ks[3], 64, 32, HEADS),
                         init_gat_params(ks[4], 128, 16, HEADS)]
    else:
        params["gat"] = [init_gat_params(ks[3], 64, 32, HEADS),
                         init_gat_params(ks[4], 128, 32, HEADS),
                         init_gat_params(ks[5], 128, 16, HEADS)]
    return params


def derive_gat_params(gp, heads, c_out):
    hcout = heads * c_out
    w_bf = gp["w"].astype(jnp.bfloat16)                        # [C_in, H*Cout]
    a_t = jnp.zeros((hcout, 2 * heads), jnp.float32)           # block-diag att^T
    for h in range(heads):
        a_t = a_t.at[h * c_out:(h + 1) * c_out, h].set(gp["att_src"][h])
        a_t = a_t.at[h * c_out:(h + 1) * c_out, heads + h].set(gp["att_dst"][h])
    # alpha_edge(j->i)[h] = edge_attr * k[h], k[h] = <lin_edge_w[h,:], att_edge[h,:]>
    # (exact for edge_dim == 1, which is what this module uses)
    k_edge = jnp.sum(gp["w_edge"].reshape(heads, c_out) * gp["att_edge"], axis=-1)
    return (w_bf, a_t.astype(jnp.bfloat16), k_edge.astype(jnp.float32),
            gp["bias"][None, :].astype(jnp.float32))


def build_dense(edge_src, edge_dst, edge_attr, n, n_pad):
    # GATConv adds self-loops; fill_value='mean' => self-loop attr of node i is
    # the mean of edge_attr over edges whose target is i (0 if none).
    loops = jnp.arange(n, dtype=edge_src.dtype)
    src_all = jnp.concatenate([edge_src, loops])
    dst_all = jnp.concatenate([edge_dst, loops])
    adj = jnp.zeros((n_pad, n_pad), jnp.int8).at[dst_all, src_all].set(1)
    if edge_attr is None:
        return adj, None
    sums = jax.ops.segment_sum(edge_attr, edge_dst, num_segments=n)
    cnts = jax.ops.segment_sum(jnp.ones_like(edge_attr), edge_dst, num_segments=n)
    self_attr = sums / jnp.maximum(cnts, 1.0)
    attr_all = jnp.concatenate([edge_attr, self_attr])
    ea = jnp.zeros((n_pad, n_pad), jnp.float32).at[dst_all, src_all].set(attr_all)
    return adj, ea.astype(jnp.bfloat16)


# --------------------------------------------------------------------------
# Forward pass
# --------------------------------------------------------------------------
def graph_conv_forward(node_ids, pos, edge_src, edge_dst, edge_attr, batch,
                       params, *, n_graphs, use_edge_attr=True,
                       row_tile=None, col_tile=None):
    n = node_ids.shape[0]
    tm, tn, n_pad = _plan_tiles(n, row_tile, col_tile)
    pad = n_pad - n
    vmem_limit = _vmem_limit_bytes()

    adj, eattr = build_dense(edge_src, edge_dst,
                             edge_attr if use_edge_attr else None, n, n_pad)

    # TODO(synk): embedding gather + COO->dense adjacency scatter stay as plain
    # JAX glue (data-dependent gather/scatter not expressible as a BlockSpec).
    emb = jnp.pad(jnp.take(params["embed"], node_ids, axis=0), ((0, pad), (0, 0)))
    pos_last = jnp.pad(pos[:, -1:], ((0, pad), (0, 0)))   # pos[:, -1].unsqueeze(1)

    x = None
    for li, gp in enumerate(params["gat"]):
        heads, c_out = gp["att_src"].shape
        hcout = heads * c_out
        is_first = li == 0
        w_bf, a_t_bf, k_edge, bias2d = derive_gat_params(gp, heads, c_out)

        x_inputs = ((emb, pos_last, params["fc_w"], params["fc_b"])
                    if is_first else (x,))
        xw_bf, coef = run_projection(
            x_inputs, w_bf, a_t_bf, n_pad=n_pad, tm=tm, heads=heads,
            hcout=hcout, fuse_prep=is_first, apply_relu=not is_first,
            vmem_limit=vmem_limit)

        csrc_t = coef.T                                    # [2H, N_pad] (tiny)
        x = run_attention(coef, csrc_t, xw_bf, adj, eattr, k_edge, bias2d,
                          n_pad=n_pad, tm=tm, tn=tn, heads=heads, c_out=c_out,
                          vmem_limit=vmem_limit)

    # TODO(synk): global_max_pool is a data-dependent segment reduction; kept as
    # a tiny XLA op so the last GAT layer stays row-"parallel" (v7x 2 TCs).
    return jax.ops.segment_max(x[:n], batch, num_segments=n_graphs)


if __name__ == "__main__":
    key = jax.random.PRNGKey(0)
    num_embeddings = 20
    depth = 2          # gat1: 64 -> 32x4 = 128 ; gat2: 128 -> 16x4 = 64
    use_w = True
    n_per_graph = 120
    n_graphs = 2
    n_nodes = n_per_graph * n_graphs   # 240 -> padded to 256 (exercises padding)

    k_ids, k_pos, k_attr, k_params = jax.random.split(key, 4)
    node_ids = jax.random.randint(k_ids, (n_nodes,), 0, num_embeddings,
                                  dtype=jnp.int32)
    pos = jax.random.normal(k_pos, (n_nodes, 3), jnp.float32)
    batch = jnp.repeat(jnp.arange(n_graphs, dtype=jnp.int32), n_per_graph)

    # bidirectional ring within each graph
    i_local = jnp.arange(n_per_graph, dtype=jnp.int32)
    j_local = (i_local + 1) % n_per_graph
    base = (jnp.arange(n_graphs, dtype=jnp.int32) * n_per_graph)[:, None]
    fwd_src = (base + i_local[None, :]).reshape(-1)
    fwd_dst = (base + j_local[None, :]).reshape(-1)
    edge_src = jnp.concatenate([fwd_src, fwd_dst])
    edge_dst = jnp.concatenate([fwd_dst, fwd_src])
    edge_attr = jax.random.uniform(k_attr, (edge_src.shape[0],), jnp.float32)

    params = init_params(k_params, num_embeddings, depth)

    out = graph_conv_forward(node_ids, pos, edge_src, edge_dst, edge_attr,
                             batch, params, n_graphs=n_graphs,
                             use_edge_attr=use_w,
                             row_tile=128, col_tile=128)  # 2x2 attention grid:
                                                          # exercises row-parallel
                                                          # tiles + online softmax
    out = jax.block_until_ready(out)
    assert out.shape == (n_graphs, 64), out.shape
    assert bool(jnp.all(jnp.isfinite(out)))
    print("KERNEL_OK")
</pallas_src>

<mosaic_0001>
module attributes {stable_mosaic.version = 11 : i64} {
  func.func @kernel(%arg0: i32, %arg1: memref<128x64xf32, #tpu.memory_space<vmem>>, %arg2: memref<128x1xf32, #tpu.memory_space<vmem>>, %arg3: memref<1x64xf32, #tpu.memory_space<vmem>>, %arg4: memref<1x64xf32, #tpu.memory_space<vmem>>, %arg5: memref<64x128xbf16, #tpu.memory_space<vmem>>, %arg6: memref<128x8xbf16, #tpu.memory_space<vmem>>, %arg7: memref<128x128xbf16, #tpu.memory_space<vmem>>, %arg8: memref<128x8xf32, #tpu.memory_space<vmem>>) attributes {dimension_semantics = [#tpu.dimension_semantics<parallel>], iteration_bounds = array<i64: 2>, scalar_prefetch = 0 : i64, scratch_operands = 0 : i64, tpu.core_type = #tpu.core_type<tc>, window_params = [{transform_indices = @transform_0, window_bounds = array<i64: 128, 64>}, {transform_indices = @transform_1, window_bounds = array<i64: 128, 1>}, {pipeline_mode = #tpu.pipeline_mode<synchronous>, transform_indices = @transform_2, window_bounds = array<i64: 1, 64>}, {pipeline_mode = #tpu.pipeline_mode<synchronous>, transform_indices = @transform_3, window_bounds = array<i64: 1, 64>}, {pipeline_mode = #tpu.pipeline_mode<synchronous>, transform_indices = @transform_4, window_bounds = array<i64: 64, 128>}, {pipeline_mode = #tpu.pipeline_mode<synchronous>, transform_indices = @transform_5, window_bounds = array<i64: 128, 8>}, {transform_indices = @transform_6, window_bounds = array<i64: 128, 128>}, {transform_indices = @transform_7, window_bounds = array<i64: 128, 8>}]} {
    %c0 = arith.constant 0 : index
    %c0_0 = arith.constant 0 : index
    %0 = vector.load %arg2[%c0, %c0_0] : memref<128x1xf32, #tpu.memory_space<vmem>>, vector<128x1xf32>
    %c0_1 = arith.constant 0 : index
    %c0_2 = arith.constant 0 : index
    %1 = vector.load %arg3[%c0_1, %c0_2] : memref<1x64xf32, #tpu.memory_space<vmem>>, vector<1x64xf32>
    %2 = vector.broadcast %0 : vector<128x1xf32> to vector<128x64xf32>
    %3 = vector.broadcast %1 : vector<1x64xf32> to vector<128x64xf32>
    %4 = arith.mulf %2, %3 : vector<128x64xf32>
    %c0_3 = arith.constant 0 : index
    %c0_4 = arith.constant 0 : index
    %5 = vector.load %arg4[%c0_3, %c0_4] : memref<1x64xf32, #tpu.memory_space<vmem>>, vector<1x64xf32>
    %6 = vector.broadcast %5 : vector<1x64xf32> to vector<128x64xf32>
    %7 = arith.addf %4, %6 : vector<128x64xf32>
    %cst = arith.constant 0.000000e+00 : f32
    %8 = vector.broadcast %cst : f32 to vector<128x64xf32>
    %9 = arith.maximumf %7, %8 : vector<128x64xf32>
    %c0_5 = arith.constant 0 : index
    %c0_6 = arith.constant 0 : index
    %10 = vector.load %arg1[%c0_5, %c0_6] : memref<128x64xf32, #tpu.memory_space<vmem>>, vector<128x64xf32>
    %11 = arith.addf %10, %9 : vector<128x64xf32>
    %12 = arith.truncf %11 : vector<128x64xf32> to vector<128x64xbf16>
    %c0_7 = arith.constant 0 : index
    %c0_8 = arith.constant 0 : index
    %13 = vector.load %arg5[%c0_7, %c0_8] : memref<64x128xbf16, #tpu.memory_space<vmem>>, vector<64x128xbf16>
    %cst_9 = arith.constant dense<0.000000e+00> : vector<128x128xf32>
    %14 = tpu.matmul %12, %13, %cst_9 {dimension_numbers = #tpu.dot_dimension_numbers<[1], [0], [0], [1], [0, 0, 1, 1], [], []>} : vector<128x64xbf16>, vector<64x128xbf16>, vector<128x128xf32> -> vector<128x128xf32>
    %15 = arith.truncf %14 : vector<128x128xf32> to vector<128x128xbf16>
    %c0_10 = arith.constant 0 : index
    %c0_11 = arith.constant 0 : index
    %16 = vector.load %arg6[%c0_10, %c0_11] : memref<128x8xbf16, #tpu.memory_space<vmem>>, vector<128x8xbf16>
    %cst_12 = arith.constant dense<0.000000e+00> : vector<128x8xf32>
    %17 = tpu.matmul %15, %16, %cst_12 {dimension_numbers = #tpu.dot_dimension_numbers<[1], [0], [0], [1], [0, 0, 1, 1], [], []>} : vector<128x128xbf16>, vector<128x8xbf16>, vector<128x8xf32> -> vector<128x8xf32>
    %c0_13 = arith.constant 0 : index
    %c0_14 = arith.constant 0 : index
    %18 = vector.load %arg8[%c0_13, %c0_14] : memref<128x8xf32, #tpu.memory_space<vmem>>, vector<128x8xf32>
    tpu.vector_store %arg8[%c0_13, %c0_14], %17 {strides = array<i32>} : memref<128x8xf32, #tpu.memory_space<vmem>>, vector<128x8xf32>,
    %c0_15 = arith.constant 0 : index
    %c0_16 = arith.constant 0 : index
    %19 = vector.load %arg7[%c0_15, %c0_16] : memref<128x128xbf16, #tpu.memory_space<vmem>>, vector<128x128xbf16>
    tpu.vector_store %arg7[%c0_15, %c0_16], %15 {strides = array<i32>} : memref<128x128xbf16, #tpu.memory_space<vmem>>, vector<128x128xbf16>,
    return
  }
  func.func @transform_0(%arg0: i32) -> (i32, i32) {
    %c0_i32 = arith.constant 0 : i32
    %c0_i32_0 = arith.constant 0 : i32
    return %arg0, %c0_i32 : i32, i32
  }
  func.func @transform_1(%arg0: i32) -> (i32, i32) {
    %c0_i32 = arith.constant 0 : i32
    %c0_i32_0 = arith.constant 0 : i32
    return %arg0, %c0_i32 : i32, i32
  }
  func.func @transform_2(%arg0: i32) -> (i32, i32) {
    %c0_i32 = arith.constant 0 : i32
    %c0_i32_0 = arith.constant 0 : i32
    %c0_i32_1 = arith.constant 0 : i32
    return %c0_i32, %c0_i32_0 : i32, i32
  }
  func.func @transform_3(%arg0: i32) -> (i32, i32) {
    %c0_i32 = arith.constant 0 : i32
    %c0_i32_0 = arith.constant 0 : i32
    %c0_i32_1 = arith.constant 0 : i32
    return %c0_i32, %c0_i32_0 : i32, i32
  }
  func.func @transform_4(%arg0: i32) -> (i32, i32) {
    %c0_i32 = arith.constant 0 : i32
    %c0_i32_0 = arith.constant 0 : i32
    %c0_i32_1 = arith.constant 0 : i32
    return %c0_i32, %c0_i32_0 : i32, i32
  }
  func.func @transform_5(%arg0: i32) -> (i32, i32) {
    %c0_i32 = arith.constant 0 : i32
    %c0_i32_0 = arith.constant 0 : i32
    %c0_i32_1 = arith.constant 0 : i32
    return %c0_i32, %c0_i32_0 : i32, i32
  }
  func.func @transform_6(%arg0: i32) -> (i32, i32) {
    %c0_i32 = arith.constant 0 : i32
    %c0_i32_0 = arith.constant 0 : i32
    return %arg0, %c0_i32 : i32, i32
  }
  func.func @transform_7(%arg0: i32) -> (i32, i32) {
    %c0_i32 = arith.constant 0 : i32
    %c0_i32_0 = arith.constant 0 : i32
    return %arg0, %c0_i32 : i32, i32
  }
}

</mosaic_0001>

<bundles_post_ra>
// kernel: tpu_custom_call.1
= control target key start
LH: loop header
LB: loop body
LE: loop exit
PB: predicated region body
PF: predicated region fallthrough
CT: control target
= control target key end

     0   :  { %13 = vsyncpa [#allocation3], 0  ;;  %s1748_s0 = inlined_call_operand.vmem [shape: f32[256,64], index: 0, kind: input, shape index: {}]   ;;  %s1749_s1 = inlined_call_operand.vmem [shape: f32[256,1], index: 1, kind: input, shape index: {}]   ;;  %s1750_s2 = inlined_call_operand.vmem [shape: f32[1,64], index: 2, kind: input, shape index: {}]   ;;  %s1751_s3 = inlined_call_operand.vmem [shape: f32[1,64], index: 3, kind: input, shape index: {}]   ;;  %s1752_s4 = inlined_call_operand.vmem [shape: bf16[64,128], index: 4, kind: input, shape index: {}]   ;;  %s1753_s5 = inlined_call_operand.vmem [shape: bf16[128,8], index: 5, kind: input, shape index: {}]   ;;  %s1754_s6 = inlined_call_operand.hbm [shape: bf16[256,128], index: 6, kind: output, shape index: {0}]   ;;  %s1755_s7 = inlined_call_operand.vmem [shape: f32[256,8], index: 7, kind: output, shape index: {1}]  }
   0x1   :  { %15 = vsyncpa [#allocation3 + $0x1], 0  ;;  %s1429_s24 = smov 0   ;;  %s1431_s25 = smov 0  }
   0x2   :  { %s1433_s26 = smov 0   ;;  %s1435_s27 = smov 0  }
   0x3 LB: > { %s1450_s28 = sadd.s32 4294967295, %s1383_s27   ;;  %s1049_s29 = sadd.s32 4294967294, %s1383_s27   ;;  %s1383_s27 = sphi %s1435_s27, %s1761_s27   ;;  %s1379_s26 = sphi %s1433_s26, %s1760_s26   ;;  %s1375_s25 = sphi %s1431_s25, %s1759_s25   ;;  %s1371_s24 = sphi %s1429_s24, %s1758_s24  }
   0x4   : > { %s1454_s30 = sadd.s32 1, %s1383_s27   ;;  %s164_s8 = sadd.s32 1, %s1379_s26 }
   0x5   : > { %s161_s9 = ssub.s32 %s1383_s27, %s1454_s30  ;;  %p174_p0 = scmp.ne.s32.totalorder %s1379_s26, %s1375_s25 }
   0x6   : > { %p162_p1 = scmp.eq.s32.totalorder %s161_s9, 0  ;;  %p175_p2 = scmp.eq.s32.totalorder %s1450_s28, 1 }
   0x7   : > { %p180_p3 = scmp.ne.s32.totalorder %s1375_s25, %s1371_s24  ;;  %p181_p4 = scmp.eq.s32.totalorder %s1049_s29, 1 }
   0x8   : > { %s1465_s10 = scalar_select %p162_p1, %s1379_s26, %s164_s8  }
   0x9   : > { %p1467_p5 = por %p175_p2, %p174_p0  ;;  %p1471_p6 = por %p181_p4, %p180_p3 }
   0xa   : > { %p1052_p7 = scmp.ge.s32.totalorder %s1383_s27, 1  ;;  %p255_p8 = scmp.lt.s32.totalorder %s1383_s27, 3 }
   0xc   : > { %p256_p9 = pnand %p1052_p7, %p255_p8 }
   0xd   : > { %s1054_s13 = sshll.u32 (!%p256_p9), %s1450_s28, 4  ;;  %s287_s23 = sand.u32 (!%p256_p9), 1, %s1375_s25  }
   0xe   : > { %259 = sbr.rel (%p256_p9) target bundleno = 589 (0x24d), region = 44  ;;  %p298_p10 = scmp.lt.s32.totalorder (!%p256_p9), %s1054_s13, 31 }
   0xf   : > { %s1053_s29 = sshll.u32 (!%p256_p9), %s287_s23, 6  ;;  %s1119_s9 = sshll.u32 (!%p256_p9), %s1450_s28, 10 }
  0x10   : > { %s1649_s8 = scalar_lea.vmem (!%p256_p9), [#allocation2], %s1053_s29  ;;  %s1664_s17 = scalar_lea.hbm (!%p256_p9), %s1754_s6, %s1119_s9 }
  0x11   : > { %s1386_s28 = smov (!%p256_p9), [#allocation2]  }
  0x12   : > { %s1327_s20 = sshll.u32 (!%p256_p9), %s1386_s28, 4  ;;  %s1328_s20 = int_to_ptr.vmem [resolvable:$false] %s1327_s20 }
  0x13   : > { %v1385_v0 = vmov 0   ;;  %v1311_v1 = vld [vmem:[%s1752_s4 + $0x18] sm:$0xff]   ;;  %s1763_s13 = smov (!%p298_p10, %s1054_s13), 31  ;;  %v1312_v2 = vld [vmem:[%s1752_s4 + $0x10] sm:$0xff]   ;;  %v1313_v9 = vld [vmem:[%s1752_s4 + $0x8] sm:$0xff]   ;;  %vm547_vm0 = vcmask 523264  }
  0x14   : > { %1310 = vset.pattern.permute.xlu1 %v1385_v0  ;;  %1309 = vset.pattern.permute.xlu0 %v1385_v0  ;;  %s1481_s16 = sshll.u32 %s1763_s13, 3  ;;  %v1314_v10 = vld [vmem:[%s1752_s4] sm:$0xff]   ;;  %v1517_v21 = vld [vmem:[%s1753_s5 + $0x38] sm:$0xff]   ;;  %v1523_v22 = vld [vmem:[%s1753_s5 + $0x30] sm:$0xff]   ;;  %s946_s13 = sshll.u32 %s1649_s8, 4  ;;  %s1666_s13 = int_to_ptr.vmem [resolvable:$true] %s946_s13 }
  0x15   : > { %1195 = vmatprep.subr.bf16.mxu0 %v1311_v1  ;;  %s1490_s21 = scalar_lea.vmem %s1749_s1, %s1481_s16  ;;  %1251 = vmatprep.subr.bf16.mxu1 %v1517_v21  ;;  %v1531_v23 = vld [vmem:[%s1753_s5 + $0x28] sm:$0xff]   ;;  %v1538_v24 = vld [vmem:[%s1753_s5 + $0x20] sm:$0xff]   ;;  %v1545_v25 = vld [vmem:[%s1753_s5 + $0x18] sm:$0xff]   ;;  %s1574_s18 = scalar_lea.vmem %s1748_s0, %s1481_s16 }
  0x16   : > { %1196 = vmatpush3.bf16.msra.mxu0 %v1311_v1  ;;  %v319_v3 = vld [vmem:[%s1490_s21 + $0x10] sm:$0xff]  ;;  %v317_v4 = vld [vmem:[%s1490_s21] sm:$0xff]  ;;  %v320_v5 = vld [vmem:[%s1490_s21 + $0x18] sm:$0xff]  ;;  %1259 = vmatpush3.bf16.msra.mxu1 %v1517_v21  ;;  %s1323_s19 = scalar_lea.vmem %s1666_s13, 1024  ;;  %p1330_p0 = scmp.lt.s32.totalorder %s1666_s13, %s1328_s20 }
  0x17   : > { %1197 = vmatprep.subr.bf16.mxu0 %v1312_v2  ;;  %346 = vperm.xlu1 %1310, %v319_v3   ;;  %v318_v6 = vld [vmem:[%s1490_s21 + $0x8] sm:$0xff]  ;;  %v321_v8 = vld [vmem:[%s1490_s21 + $0x20] sm:$0xff]  ;;  %v324_v11 = vld [vmem:[%s1490_s21 + $0x38] sm:$0xff]  ;;  %p1324_p11 = scmp.ne.s32.totalorder %s1666_s13, %s1323_s19 }
  0x18   : > { %336 = vperm.xlu0 %1309, %v317_v4   ;;  %v322_v7 = vld [vmem:[%s1490_s21 + $0x28] sm:$0xff]  ;;  %v323_v12 = vld [vmem:[%s1490_s21 + $0x30] sm:$0xff]  ;;  %v325_v14 = vld [vmem:[%s1490_s21 + $0x40] sm:$0xff]  ;;  %1252 = vmatprep.subr.bf16.mxu1 %v1523_v22 }
  0x19   : > { %v326_v13 = vld [vmem:[%s1490_s21 + $0x48] sm:$0xff]  ;;  %v328_v15 = vld [vmem:[%s1490_s21 + $0x58] sm:$0xff]  ;;  %v327_v16 = vld [vmem:[%s1490_s21 + $0x50] sm:$0xff]  ;;  %p1325_p12 = pnand %p1324_p11, %p1467_p5 }
  0x1a   : > { %1198 = vmatpush3.bf16.msra.mxu0 %v1312_v2  ;;  %v330_v17 = vld [vmem:[%s1490_s21 + $0x68] sm:$0xff]  ;;  %v329_v18 = vld [vmem:[%s1490_s21 + $0x60] sm:$0xff]  ;;  %v332_v19 = vld [vmem:[%s1490_s21 + $0x78] sm:$0xff]  ;;  %1260 = vmatpush3.bf16.msra.mxu1 %v1523_v22 }
  0x1b   : > { %351 = vperm.xlu1 %1310, %v320_v5   ;;  %1199 = vmatprep.subr.bf16.mxu0 %v1313_v9  ;;  %v331_v20 = vld [vmem:[%s1490_s21 + $0x70] sm:$0xff]  ;;  %v1560_v27 = vld [vmem:[%s1750_s2] ss:$0 sm:$0xff]  ;;  %v478_v44 = vld [vmem:[%s1574_s18 + $0x18] sm:$0xff]  ;;  %p1326_p13 = pneg %p1325_p12  ;;  %s1329_s21 = scalar_lea.vmem %s1328_s20, 2048 }
  0x1c   : > { %341 = vperm.xlu0 %1309, %v318_v6   ;;  %1253 = vmatprep.subr.bf16.mxu1 %v1531_v23  ;;  %v1552_v26 = vld [vmem:[%s1753_s5 + $0x10] sm:$0xff]   ;;  %v1565_v28 = vld [vmem:[%s1751_s3] ss:$0 sm:$0xff]  ;;  %v476_v47 = vld [vmem:[%s1574_s18 + $0x8] sm:$0xff]  ;;  %p1331_p1 = scmp.lt.s32.totalorder %s1329_s21, %s1323_s19 }
  0x1d   : > { %v477_v40 = vld [vmem:[%s1574_s18 + $0x10] sm:$0xff]  ;;  %v475_v52 = vld [vmem:[%s1574_s18] sm:$0xff]  ;;  %v480_v58 = vld [vmem:[%s1574_s18 + $0x28] sm:$0xff] }
  0x1e   : > { %1200 = vmatpush3.bf16.msra.mxu0 %v1313_v9  ;;  %1261 = vmatpush3.bf16.msra.mxu1 %v1531_v23  ;;  %v479_v59 = vld [vmem:[%s1574_s18 + $0x20] sm:$0xff]  ;;  %p1332_p2 = por %p1331_p1, %p1330_p0 }
  0x1f   : > { %361 = vperm.xlu1 %1310, %v322_v7   ;;  %1201 = vmatprep.subr.bf16.mxu0 %v1314_v10 }
  0x20   : > { %356 = vperm.xlu0 %1309, %v321_v8   ;;  %1254 = vmatprep.subr.bf16.mxu1 %v1538_v24  ;;  %v482_v8 = vld [vmem:[%s1574_s18 + $0x38] sm:$0xff]  ;;  %p1333_p3 = pnand %p1332_p2, %p1326_p13 }
  0x22   : > { %1202 = vmatpush3.bf16.msra.mxu0 %v1314_v10  ;;  %1262 = vmatpush3.bf16.msra.mxu1 %v1538_v24 }
  0x23   : > { %371 = vperm.xlu1 %1310, %v324_v11   ;;  %1219 = vmatprep.subr.bf16.mxu0 %v1517_v21 }
  0x24   : > { %366 = vperm.xlu0 %1309, %v323_v12   ;;  %1255 = vmatprep.subr.bf16.mxu1 %v1545_v25 }
  0x26   : > { %1263 = vmatpush3.bf16.msra.mxu1 %v1545_v25 }
  0x27   : > { %381 = vperm.xlu1 %1310, %v326_v13   ;;  %1256 = vmatprep.subr.bf16.mxu1 %v1552_v26 }
  0x28   : > { %376 = vperm.xlu0 %1309, %v325_v14   ;;  %v481_v14 = vld [vmem:[%s1574_s18 + $0x30] sm:$0xff] }
  0x2a   : > { %1264 = vmatpush3.bf16.msra.mxu1 %v1552_v26 }
  0x2b   : > { %391 = vperm.xlu1 %1310, %v328_v15  }
  0x2c   : > { %386 = vperm.xlu0 %1309, %v327_v16  }
  0x2f   : > { %401 = vperm.xlu1 %1310, %v330_v17  }
  0x30   : > { %396 = vperm.xlu0 %1309, %v329_v18  }
  0x33   : > { %411 = vperm.xlu1 %1310, %v332_v19  }
  0x34   : > { %406 = vperm.xlu0 %1309, %v331_v20  }
  0x92   : > { %v347_v29 = vpop.permute.xlu1 %346 }
  0x93   : > { %v337_v30 = vpop.permute.xlu0 %336  ;;  %v422_v31 = vmul.f32 %v1560_v27, %v347_v29 }
  0x94   : > { %v420_v32 = vmul.f32 %v1560_v27, %v337_v30  ;;  %v484_v30 = vld [vmem:[%s1574_s18 + $0x48] sm:$0xff] }
  0x95   : > { %v445_v33 = vadd.f32 %v1565_v28, %v422_v31  ;;  %v483_v31 = vld [vmem:[%s1574_s18 + $0x40] sm:$0xff] }
  0x96   : > { %v443_v34 = vadd.f32 %v1565_v28, %v420_v32  ;;  %v352_v35 = vpop.permute.xlu1 %351 }
  0x97   : > { %v342_v36 = vpop.permute.xlu0 %341  ;;  %v423_v37 = vmul.f32 %v1560_v27, %v352_v35  ;;  %v461_v39 = vmax.f32 %v445_v33, 0.0 }
  0x98   : > { %v421_v38 = vmul.f32 %v1560_v27, %v342_v36  ;;  %v459_v43 = vmax.f32 %v443_v34, 0.0 }
  0x99   : > { %v446_v41 = vadd.f32 %v1565_v28, %v423_v37  ;;  %v493_v53 = vadd.f32 %v477_v40, %v461_v39 }
  0x9a   : > { %v444_v42 = vadd.f32 %v1565_v28, %v421_v38  ;;  %v362_v45 = vpop.permute.xlu1 %361  ;;  %v491_v62 = vadd.f32 %v475_v52, %v459_v43  ;;  %v485_v43 = vld [vmem:[%s1574_s18 + $0x50] sm:$0xff] }
  0x9b   : > { %v357_v46 = vpop.permute.xlu0 %356  ;;  %v462_v48 = vmax.f32 %v446_v41, 0.0  ;;  %v425_v50 = vmul.f32 %v1560_v27, %v362_v45 }
  0x9c   : > { %v460_v49 = vmax.f32 %v444_v42, 0.0  ;;  %v424_v51 = vmul.f32 %v1560_v27, %v357_v46  ;;  %v486_v42 = vld [vmem:[%s1574_s18 + $0x58] sm:$0xff] }
  0x9d   : > { %v494_v54 = vadd.f32 %v478_v44, %v462_v48  ;;  %v448_v55 = vadd.f32 %v1565_v28, %v425_v50 }
  0x9e   : > { %v447_v56 = vadd.f32 %v1565_v28, %v424_v51  ;;  %v492_v57 = vadd.f32 %v476_v47, %v460_v49  ;;  %v372_v60 = vpop.permute.xlu1 %371 }
  0x9f   : > { %v367_v61 = vpop.permute.xlu0 %366  ;;  %v508_v63 = vpack.c.bf16 %v494_v54, %v493_v53  ;;  %v464_v0 = vmax.f32 %v448_v55, 0.0  ;;  %v427_v2 = vmul.f32 %v1560_v27, %v372_v60  ;;  %v488_v53 = vld [vmem:[%s1574_s18 + $0x68] sm:$0xff] }
  0xa0   : > { %v463_v1 = vmax.f32 %v447_v56, 0.0  ;;  %v426_v3 = vmul.f32 %v1560_v27, %v367_v61  ;;  %v507_v4 = vpack.c.bf16 %v492_v57, %v491_v62 }
  0xa1   : > { %v496_v5 = vadd.f32 %v480_v58, %v464_v0  ;;  %v450_v7 = vadd.f32 %v1565_v28, %v427_v2  ;;  %v490_v2 = vld [vmem:[%s1574_s18 + $0x78] sm:$0xff] }
  0xa2   : > { %v495_v6 = vadd.f32 %v479_v59, %v463_v1  ;;  %v449_v9 = vadd.f32 %v1565_v28, %v426_v3  ;;  %1203 = vmatprep.mubr.msk.bf16.mxu0 %vm547_vm0, %v507_v4  ;;  %v382_v10 = vpop.permute.xlu1 %381  ;;  %v487_v59 = vld [vmem:[%s1574_s18 + $0x60] sm:$0xff]  ;;  %v489_v3 = vld [vmem:[%s1574_s18 + $0x70] sm:$0xff]  ;;  %s1670_s18 = scalar_lea.sflag [#allocation3], %s287_s23 }
  0xa3   : > { %v377_v11 = vpop.permute.xlu0 %376  ;;  %v466_v13 = vmax.f32 %v450_v7, 0.0  ;;  %v429_v15 = vmul.f32 %v1560_v27, %v382_v10  ;;  %1204 = vmatmul.mubr.msk.bf16.vlgmr.msra.gmra.mxu0 %vm547_vm0, %v508_v63 }
  0xa4   : > { %v509_v12 = vpack.c.bf16 %v496_v5, %v495_v6  ;;  %v428_v16 = vmul.f32 %v1560_v27, %v377_v11  ;;  %v465_v17 = vmax.f32 %v449_v9, 0.0  ;;  %1220 = vmatpush3.bf16.msra.mxu0 %v1517_v21 }
  0xa5   : > { %v498_v18 = vadd.f32 %v482_v8, %v466_v13  ;;  %v452_v19 = vadd.f32 %v1565_v28, %v429_v15  ;;  %1221 = vmatprep.subr.bf16.mxu0 %v1523_v22 }
  0xa6   : > { %v451_v20 = vadd.f32 %v1565_v28, %v428_v16  ;;  %1207 = vmatprep.mubr.msk.bf16.mxu0 %vm547_vm0, %v509_v12  ;;  %v497_v29 = vadd.f32 %v481_v14, %v465_v17  ;;  %v392_v32 = vpop.permute.xlu1 %391 }
  0xa7   : > { %v387_v33 = vpop.permute.xlu0 %386  ;;  %v468_v34 = vmax.f32 %v452_v19, 0.0  ;;  %v431_v21 = vmul.f32 %v1560_v27, %v392_v32 }
  0xa8   : > { %v467_v35 = vmax.f32 %v451_v20, 0.0  ;;  %v430_v36 = vmul.f32 %v1560_v27, %v387_v33  ;;  %v510_v37 = vpack.c.bf16 %v498_v18, %v497_v29  ;;  %1222 = vmatpush3.bf16.msra.mxu0 %v1523_v22 }
  0xa9   : > { %v500_v38 = vadd.f32 %v484_v30, %v468_v34  ;;  %v454_v40 = vadd.f32 %v1565_v28, %v431_v21  ;;  %1223 = vmatprep.subr.bf16.mxu0 %v1531_v23 }
  0xaa   : > { %v499_v39 = vadd.f32 %v483_v31, %v467_v35  ;;  %v453_v41 = vadd.f32 %v1565_v28, %v430_v36  ;;  %v402_v44 = vpop.permute.xlu1 %401 }
  0xab   : > { %v397_v45 = vpop.permute.xlu0 %396  ;;  %v470_v47 = vmax.f32 %v454_v40, 0.0  ;;  %v433_v49 = vmul.f32 %v1560_v27, %v402_v44  ;;  %1208 = vmatmul.mubr.msk.bf16.gmra.mxu0 %vm547_vm0, %v510_v37 }
  0xac   : > { %v511_v46 = vpack.c.bf16 %v500_v38, %v499_v39  ;;  %v469_v48 = vmax.f32 %v453_v41, 0.0  ;;  %v432_v22 = vmul.f32 %v1560_v27, %v397_v45  ;;  %1224 = vmatpush3.bf16.msra.mxu0 %v1531_v23 }
  0xad   : > { %v502_v50 = vadd.f32 %v486_v42, %v470_v47  ;;  %v456_v52 = vadd.f32 %v1565_v28, %v433_v49  ;;  %1225 = vmatprep.subr.bf16.mxu0 %v1538_v24 }
  0xae   : > { %v501_v51 = vadd.f32 %v485_v43, %v469_v48  ;;  %1211 = vmatprep.mubr.msk.bf16.mxu0 %vm547_vm0, %v511_v46  ;;  %v455_v54 = vadd.f32 %v1565_v28, %v432_v22  ;;  %v412_v55 = vpop.permute.xlu1 %411 }
  0xaf   : > { %v407_v56 = vpop.permute.xlu0 %406  ;;  %v472_v58 = vmax.f32 %v456_v52, 0.0  ;;  %v435_v23 = vmul.f32 %v1560_v27, %v412_v55 }
  0xb0   : > { %v512_v57 = vpack.c.bf16 %v502_v50, %v501_v51  ;;  %v434_v60 = vmul.f32 %v1560_v27, %v407_v56  ;;  %v471_v61 = vmax.f32 %v455_v54, 0.0  ;;  %1226 = vmatpush3.bf16.msra.mxu0 %v1538_v24 }
  0xb1   : > { %v504_v62 = vadd.f32 %v488_v53, %v472_v58  ;;  %v458_v63 = vadd.f32 %v1565_v28, %v435_v23  ;;  %1227 = vmatprep.subr.bf16.mxu0 %v1545_v25 }
  0xb2   : > { %v457_v0 = vadd.f32 %v1565_v28, %v434_v60  ;;  %v503_v1 = vadd.f32 %v487_v59, %v471_v61  ;;  %v1321_v28 = vld [vmem:[%s1753_s5 + $0x8] sm:$0xff]  }
  0xb3   : > { %v474_v4 = vmax.f32 %v458_v63, 0.0  ;;  %1212 = vmatmul.mubr.msk.bf16.gmra.mxu0 %vm547_vm0, %v512_v57  ;;  %1257 = vmatprep.subr.bf16.mxu1 %v1321_v28 }
  0xb4   : > { %v473_v5 = vmax.f32 %v457_v0, 0.0  ;;  %v513_v6 = vpack.c.bf16 %v504_v62, %v503_v1  ;;  %1228 = vmatpush3.bf16.msra.mxu0 %v1545_v25  ;;  %1265 = vmatpush3.bf16.msra.mxu1 %v1321_v28  ;;  %v1322_v25 = vld [vmem:[%s1753_s5] sm:$0xff]  }
  0xb5   : > { %v506_v27 = vadd.f32 %v490_v2, %v474_v4  ;;  %1229 = vmatprep.subr.bf16.mxu0 %v1552_v26  ;;  %1258 = vmatprep.subr.bf16.mxu1 %v1322_v25 }
  0xb6   : > { %v505_v7 = vadd.f32 %v489_v3, %v473_v5  ;;  %1215 = vmatprep.mubr.msk.bf16.mxu0 %vm547_vm0, %v513_v6 }
  0xb8   : > { %v514_v24 = vpack.c.bf16 %v506_v27, %v505_v7  ;;  %1230 = vmatpush3.bf16.msra.mxu0 %v1552_v26  ;;  %1266 = vmatpush3.bf16.msra.mxu1 %v1322_v25 }
  0xb9   : > { %1231 = vmatprep.subr.bf16.mxu0 %v1321_v28 }
  0xbb   : > { %1216 = vmatmul.mubr.msk.bf16.gmra.mxu0 %vm547_vm0, %v514_v24 }
  0xbc   : > { %1232 = vmatpush3.bf16.msra.mxu0 %v1321_v28 }
  0xbd   : > { %1233 = vmatprep.subr.bf16.mxu0 %v1322_v25 }
  0xc0   : > { %1234 = vmatpush3.bf16.msra.mxu0 %v1322_v25 }
 0x163   : > { %v1205_v26 = vpop.f32.mrf.mxu0 }
 0x165   : > { %v606_v8 = vpop.f32.mrf.mxu0 }
 0x167   : > { %v1206_v9 = vpop.f32.mrf.mxu0 }
 0x168   : > { %v670_v10 = vpack.c.bf16 %v1206_v9, %v1205_v26 }
 0x169   : > { %v609_v11 = vpop.f32.mrf.mxu0 }
 0x16a   : > { %1160 = vst [vmem:[%s1649_s8 + $0x8] sm:$0xff] %v670_v10   ;;  %v669_v12 = vpack.c.bf16 %v609_v11, %v606_v8 }
 0x16b   : > { %v1209_v13 = vpop.f32.mrf.mxu0 }
 0x16c   : > { %1124 = vst [vmem:[%s1649_s8] sm:$0xff] %v669_v12   ;;  %1235 = vmatprep.mubr.bf16.mxu0 %v669_v12 }
 0x16d   : > { %v622_v14 = vpop.f32.mrf.mxu0  ;;  %1236 = vmatmul.mubr.bf16.vlgmr.msra.gmra.mxu0 %v670_v10 }
 0x16f   : > { %v1210_v15 = vpop.f32.mrf.mxu0 }
 0x170   : > { %v672_v16 = vpack.c.bf16 %v1210_v15, %v1209_v13 }
 0x171   : > { %v625_v17 = vpop.f32.mrf.mxu0 }
 0x172   : > { %1162 = vst [vmem:[%s1649_s8 + $0x18] sm:$0xff] %v672_v16   ;;  %v671_v18 = vpack.c.bf16 %v625_v17, %v622_v14 }
 0x173   : > { %v1213_v19 = vpop.f32.mrf.mxu0 }
 0x174   : > { %1161 = vst [vmem:[%s1649_s8 + $0x10] sm:$0xff] %v671_v18   ;;  %1239 = vmatprep.mubr.bf16.mxu1 %v671_v18 }
 0x175   : > { %v638_v20 = vpop.f32.mrf.mxu0  ;;  %1240 = vmatmul.mubr.bf16.vlgmr.msra.gmra.mxu1 %v672_v16 }
 0x177   : > { %v1214_v29 = vpop.f32.mrf.mxu0 }
 0x178   : > { %v674_v30 = vpack.c.bf16 %v1214_v29, %v1213_v19 }
 0x179   : > { %v641_v31 = vpop.f32.mrf.mxu0 }
 0x17a   : > { %1164 = vst [vmem:[%s1649_s8 + $0x28] sm:$0xff] %v674_v30   ;;  %v673_v32 = vpack.c.bf16 %v641_v31, %v638_v20 }
 0x17b   : > { %v1217_v33 = vpop.f32.mrf.mxu0 }
 0x17c   : > { %1163 = vst [vmem:[%s1649_s8 + $0x20] sm:$0xff] %v673_v32   ;;  %1243 = vmatprep.mubr.bf16.mxu1 %v673_v32 }
 0x17d   : > { %v654_v34 = vpop.f32.mrf.mxu0  ;;  %1244 = vmatmul.mubr.bf16.gmra.mxu1 %v674_v30 }
 0x17f   : > { %v1218_v35 = vpop.f32.mrf.mxu0 }
 0x180   : > { %v676_v21 = vpack.c.bf16 %v1218_v35, %v1217_v33 }
 0x181   : > { %v657_v36 = vpop.f32.mrf.mxu0 }
 0x182   : > { %1166 = vst [vmem:[%s1649_s8 + $0x38] sm:$0xff] %v676_v21   ;;  %v675_v37 = vpack.c.bf16 %v657_v36, %v654_v34 }
 0x184   : > { %1165 = vst [vmem:[%s1649_s8 + $0x30] sm:$0xff] %v675_v37   ;;  %1247 = vmatprep.mubr.bf16.mxu1 %v675_v37 }
 0x185   : > { %1248 = vmatmul.mubr.bf16.gmra.mxu1 %v676_v21 }
 0x186   : > { %1336 = shalt.err (!%p1333_p3)
}
 0x187   : > { %s1337_s22 = scalar_lea.hbm %s1664_s17, 1024  ;;  %s1341_s8 = scalar_lea.hbm %s1754_s6, 2048 }
 0x188   : > { %p1338_p4 = scmp.ne.s32.totalorder %s1664_s17, %s1337_s22  ;;  %p1342_p9 = scmp.lt.s32.totalorder %s1664_s17, %s1754_s6 }
 0x189   : > { %p1343_p10 = scmp.lt.s32.totalorder %s1341_s8, %s1337_s22 }
 0x18a   : > { %p1339_p7 = pnand %p1338_p4, %p1467_p5 }
 0x18b   : > { %p1344_p11 = por %p1343_p10, %p1342_p9 }
 0x18c   : > { %p1340_p8 = pneg %p1339_p7 }
 0x18e   : > { %p1345_p12 = pnand %p1344_p11, %p1340_p8 }
 0x190   : > { %1348 = shalt.err (!%p1345_p12)
}
 0x191   : > { %s1387_s15 = smov 64   ;;  %s1388_s19 = smov 4   ;;  %vm838_vm1 = vcmask 64512  }
 0x192   : > { %1267 = dma.vmem_to_hbm [thread:$0]  (%p1467_p5), %s1666_s13, 1024, %s1664_s17, %s1670_s18, %s1387_s15, %s1387_s15, %s1388_s19  }
 0x193   : > { %s1697_s21 = scalar_lea.vmem %s1755_s7, %s1481_s16 }
 0x22d   : > { %v1237_v38 = vpop.f32.mrf.mxu0 }
 0x22e   : > { %841 = vst.msk [vmem:[%s1697_s21 + $0x10] sm:$0xff] %vm838_vm1, %v1237_v38 }
 0x22f   : > { %v775_v39 = vpop.f32.mrf.mxu0 }
 0x230   : > { %839 = vst.msk [vmem:[%s1697_s21] sm:$0xff] %vm838_vm1, %v775_v39 }
 0x231   : > { %v1238_v40 = vpop.f32.mrf.mxu0 }
 0x232   : > { %842 = vst.msk [vmem:[%s1697_s21 + $0x18] sm:$0xff] %vm838_vm1, %v1238_v40 }
 0x233   : > { %v778_v41 = vpop.f32.mrf.mxu0 }
 0x234   : > { %840 = vst.msk [vmem:[%s1697_s21 + $0x8] sm:$0xff] %vm838_vm1, %v778_v41 }
 0x235   : > { %v1241_v42 = vpop.f32.mrf.mxu1 }
 0x236   : > { %845 = vst.msk [vmem:[%s1697_s21 + $0x30] sm:$0xff] %vm838_vm1, %v1241_v42 }
 0x237   : > { %v791_v43 = vpop.f32.mrf.mxu1 }
 0x238   : > { %843 = vst.msk [vmem:[%s1697_s21 + $0x20] sm:$0xff] %vm838_vm1, %v791_v43 }
 0x239   : > { %v1242_v44 = vpop.f32.mrf.mxu1 }
 0x23a   : > { %846 = vst.msk [vmem:[%s1697_s21 + $0x38] sm:$0xff] %vm838_vm1, %v1242_v44 }
 0x23b   : > { %v794_v45 = vpop.f32.mrf.mxu1 }
 0x23c   : > { %844 = vst.msk [vmem:[%s1697_s21 + $0x28] sm:$0xff] %vm838_vm1, %v794_v45 }
 0x23d   : > { %v1245_v46 = vpop.f32.mrf.mxu1 }
 0x23e   : > { %849 = vst.msk [vmem:[%s1697_s21 + $0x50] sm:$0xff] %vm838_vm1, %v1245_v46 }
 0x23f   : > { %v807_v47 = vpop.f32.mrf.mxu1 }
 0x240   : > { %847 = vst.msk [vmem:[%s1697_s21 + $0x40] sm:$0xff] %vm838_vm1, %v807_v47 }
 0x241   : > { %v1246_v48 = vpop.f32.mrf.mxu1 }
 0x242   : > { %850 = vst.msk [vmem:[%s1697_s21 + $0x58] sm:$0xff] %vm838_vm1, %v1246_v48 }
 0x243   : > { %v810_v49 = vpop.f32.mrf.mxu1 }
 0x244   : > { %848 = vst.msk [vmem:[%s1697_s21 + $0x48] sm:$0xff] %vm838_vm1, %v810_v49 }
 0x245   : > { %v1249_v22 = vpop.f32.mrf.mxu1 }
 0x246   : > { %853 = vst.msk [vmem:[%s1697_s21 + $0x70] sm:$0xff] %vm838_vm1, %v1249_v22 }
 0x247   : > { %v823_v50 = vpop.f32.mrf.mxu1 }
 0x248   : > { %851 = vst.msk [vmem:[%s1697_s21 + $0x60] sm:$0xff] %vm838_vm1, %v823_v50 }
 0x249   : > { %v1250_v51 = vpop.f32.mrf.mxu1 }
 0x24a   : > { %854 = vst.msk [vmem:[%s1697_s21 + $0x78] sm:$0xff] %vm838_vm1, %v1250_v51 }
 0x24b   : > { %v826_v52 = vpop.f32.mrf.mxu1 }
 0x24c   : > { %852 = vst.msk [vmem:[%s1697_s21 + $0x68] sm:$0xff] %vm838_vm1, %v826_v52 }
 0x24d PF: > { %p1273_p5 = scmp.ge.s32.totalorder %s1383_s27, 2  ;;  %s965_s11 = sand.u32 1, %s1371_s24  }
 0x24e   : > { %s966_s16 = scalar_lea.sflag [#allocation3], %s965_s11 }
 0x24f   : > { %p1270_p13 = pnand %p1273_p5, %p1471_p6 }
 0x251   : > { %p1271_p0 = pneg %p1270_p13 }
 0x253   : > { %1366 = dma.done.wait (%p1271_p0), %s966_s16, 1024  }
 0x254   : > { %1368 = vsyncadd (%p1271_p0), %s966_s16, 4294966272  ;;  %p18_p1 = scmp.ge.s32.totalorder %s1454_s30, 4   ;;  %s1758_s24 = smov %s1375_s25 }
 0x255   : > { %s1759_s25 = smov %s1379_s26  ;;  %s1760_s26 = smov %s1465_s10 }
 0x256   : > { %s1761_s27 = smov %s1454_s30  ;;  %20 = sbr.rel (!%p18_p1) target bundleno = 3 (0x3), region = 94 }
 0x25b   :  { %979 = vsyncpa [#allocation3], 1 }
 0x25c   :  { %981 = vsyncpa [#allocation3 + $0x1], 1 }

</bundles_post_ra>
